<compile_context>
chip_gen: v7x
topology: tpu7x:2x2x1
jax: 0.10.0
libtpu: 0.0.40
codegen_flags: <defaults>
</compile_context>

<pallas_src>
import functools

import jax
import jax.numpy as jnp
from jax import lax
from jax.experimental import pallas as pl
from jax.experimental.pallas import tpu as pltpu


def _calayer_kernel(x_ref, w1_ref, b1_ref, w2_ref, b2_ref,
                    wd1_ref, bd1_ref, wd2_ref, bd2_ref,
                    o_ref, *, c, cr, h, w):
    hw = h * w
    f32 = jnp.float32
    x = x_ref[0].astype(f32)                               # (C, HW), lane-dense

    # Column-validity masks (shared by both convs).  Row overflow is handled by
    # the zero fill inside shift_flat, so only the x-wrap masks are needed.
    lane = lax.broadcasted_iota(jnp.int32, (1, hw), 1)
    if (w & (w - 1)) == 0:
        col = lane & (w - 1)
    else:
        col = lane % w
    mask_dx_pos = jnp.where(col < (w - 1), 1.0, 0.0).astype(f32)   # source x+1 < w
    mask_dx_neg = jnp.where(col >= 1, 1.0, 0.0).astype(f32)        # source x-1 >= 0

    def shift_flat(act, s):
        # shifted[ci, p] = act[ci, p + s] if 0 <= p + s < hw else 0
        if s == 0:
            return act
        z = jnp.zeros((c, abs(s)), f32)
        if s > 0:
            return jnp.concatenate([act[:, s:], z], axis=1)
        return jnp.concatenate([z, act[:, :s]], axis=1)

    def conv3x3(act, wt_ref, b_ref, relu):
        # 9 shifted (C, HW) planes contracted against per-tap (C, C) weights on
        # the MXU, accumulated in f32.
        acc = jnp.zeros((c, hw), f32)
        for t in range(9):
            dy, dx = t // 3 - 1, t % 3 - 1
            v = shift_flat(act, dy * w + dx)
            if dx == 1:
                v = v * mask_dx_pos
            elif dx == -1:
                v = v * mask_dx_neg
            acc = acc + jnp.dot(wt_ref[t].astype(f32), v,
                                preferred_element_type=f32)
        acc = acc + b_ref[...].astype(f32)                 # (C, 1) lane broadcast
        if relu:
            acc = jnp.maximum(acc, 0.0)
        return acc

    # ---- y = process(x): conv3x3 -> relu -> conv3x3 -------------------------
    y1 = conv3x3(x, w1_ref, b1_ref, relu=True)
    y2 = conv3x3(y1, w2_ref, b2_ref, relu=False)

    # ---- global average pool: one lane reduction per channel ----------------
    pooled = jnp.sum(y2, axis=1, keepdims=True) * (1.0 / float(hw))     # (C, 1)

    # ---- conv_du squeeze-excite MLP, fully vectorized ------------------------
    hidden = jnp.sum(wd1_ref[...].astype(f32) * pooled, axis=0, keepdims=True)  # (1, Cr)
    hidden = jnp.maximum(hidden + bd1_ref[...].astype(f32), 0.0)
    zlog = jnp.sum(wd2_ref[...].astype(f32) * hidden, axis=1, keepdims=True)    # (C, 1)
    zlog = zlog + bd2_ref[...].astype(f32)
    gate = 1.0 / (1.0 + jnp.exp(-zlog))                                         # sigmoid

    # ---- out = z * y_pooled + x (per-channel scalar broadcast over H*W) -----
    o_ref[0] = (x + gate * pooled).astype(o_ref.dtype)


def calayer_forward(x, w1, b1, w2, b2, wd1, bd1, wd2, bd2):
    """CALayer forward.  x: (B, C, H, W); conv weights in PyTorch (O, I, kH, kW) layout."""
    b, c, h, w = x.shape
    cr = wd1.shape[0]                                      # channel // reduction
    hw = h * w
    f32 = jnp.float32

    # Per-tap (C, C) weight matrices: tap t = ky*3 + kx, laid out [co, ci].
    w1_t = jnp.transpose(w1, (2, 3, 0, 1)).reshape(9, c, c).astype(f32)
    w2_t = jnp.transpose(w2, (2, 3, 0, 1)).reshape(9, c, c).astype(f32)
    b1_c = b1.reshape(c, 1).astype(f32)
    b2_c = b2.reshape(c, 1).astype(f32)
    wd1_t = wd1[:, :, 0, 0].T.astype(f32)                  # (C, Cr), [ci, j]
    bd1_r = bd1.reshape(1, cr).astype(f32)
    wd2_m = wd2[:, :, 0, 0].astype(f32)                    # (C, Cr), [co, j]
    bd2_c = bd2.reshape(c, 1).astype(f32)

    x_flat = x.reshape(b, c, hw)                           # contiguous, lane-dense H*W

    kernel = functools.partial(_calayer_kernel, c=c, cr=cr, h=h, w=w)

    img_spec = pl.BlockSpec((1, c, hw), lambda i: (i, 0, 0))

    def const(shape):
        return pl.BlockSpec(shape, lambda i, _s=shape: (0,) * len(_s))

    out_flat = pl.pallas_call(
        kernel,
        out_shape=jax.ShapeDtypeStruct((b, c, hw), x.dtype),
        grid_spec=pltpu.PrefetchScalarGridSpec(
            num_scalar_prefetch=0,
            grid=(b,),
            in_specs=[img_spec,
                      const((9, c, c)), const((c, 1)),
                      const((9, c, c)), const((c, 1)),
                      const((c, cr)), const((1, cr)),
                      const((c, cr)), const((c, 1))],
            out_specs=img_spec,
        ),
        compiler_params=pltpu.CompilerParams(
            dimension_semantics=("parallel",),
            vmem_limit_bytes=32 * 1024 * 1024,
        ),
    )(x_flat, w1_t, b1_c, w2_t, b2_c, wd1_t, bd1_r, wd2_m, bd2_c)
    return out_flat.reshape(b, c, h, w)


def reference_calayer(x, w1, b1, w2, b2, wd1, bd1, wd2, bd2):
    """Pure-JAX reference (matches the PyTorch CALayer.forward)."""
    dn = ("NCHW", "OIHW", "NCHW")
    y = lax.conv_general_dilated(x, w1, (1, 1), ((1, 1), (1, 1)),
                                 dimension_numbers=dn) + b1.reshape(1, -1, 1, 1)
    y = jnp.maximum(y, 0.0)
    y = lax.conv_general_dilated(y, w2, (1, 1), ((1, 1), (1, 1)),
                                 dimension_numbers=dn) + b2.reshape(1, -1, 1, 1)
    y = jnp.mean(y, axis=(2, 3), keepdims=True)                         # avg_pool
    t = lax.conv_general_dilated(y, wd1, (1, 1), ((0, 0), (0, 0)),
                                 dimension_numbers=dn) + bd1.reshape(1, -1, 1, 1)
    t = jnp.maximum(t, 0.0)
    z = lax.conv_general_dilated(t, wd2, (1, 1), ((0, 0), (0, 0)),
                                 dimension_numbers=dn) + bd2.reshape(1, -1, 1, 1)
    z = jax.nn.sigmoid(z)
    return z * y + x


if __name__ == "__main__":
    key = jax.random.PRNGKey(0)
    b, c, h, w = 2, 4, 16, 16
    reduction = 2
    cr = c // reduction

    ks = jax.random.split(key, 9)
    x = jax.random.normal(ks[0], (b, c, h, w), dtype=jnp.float32)
    w1 = jax.random.normal(ks[1], (c, c, 3, 3), dtype=jnp.float32) * 0.2
    b1 = jax.random.normal(ks[2], (c,), dtype=jnp.float32) * 0.1
    w2 = jax.random.normal(ks[3], (c, c, 3, 3), dtype=jnp.float32) * 0.2
    b2 = jax.random.normal(ks[4], (c,), dtype=jnp.float32) * 0.1
    wd1 = jax.random.normal(ks[5], (cr, c, 1, 1), dtype=jnp.float32) * 0.3
    bd1 = jax.random.normal(ks[6], (cr,), dtype=jnp.float32) * 0.1
    wd2 = jax.random.normal(ks[7], (c, cr, 1, 1), dtype=jnp.float32) * 0.3
    bd2 = jax.random.normal(ks[8], (c,), dtype=jnp.float32) * 0.1

    out = calayer_forward(x, w1, b1, w2, b2, wd1, bd1, wd2, bd2)
    out = jax.block_until_ready(out)

    ref = reference_calayer(x, w1, b1, w2, b2, wd1, bd1, wd2, bd2)
    assert out.shape == (b, c, h, w)
    err = float(jnp.max(jnp.abs(out - ref)))
    assert jnp.allclose(out, ref, atol=1e-4, rtol=1e-4), f"max abs err = {err}"

    print("KERNEL_OK")
</pallas_src>

<mosaic_0001>
module attributes {stable_mosaic.version = 11 : i64} {
  func.func @_calayer_kernel(%arg0: i32, %arg1: memref<1x4x256xf32, #tpu.memory_space<vmem>>, %arg2: memref<9x4x4xf32, #tpu.memory_space<vmem>>, %arg3: memref<4x1xf32, #tpu.memory_space<vmem>>, %arg4: memref<9x4x4xf32, #tpu.memory_space<vmem>>, %arg5: memref<4x1xf32, #tpu.memory_space<vmem>>, %arg6: memref<4x2xf32, #tpu.memory_space<vmem>>, %arg7: memref<1x2xf32, #tpu.memory_space<vmem>>, %arg8: memref<4x2xf32, #tpu.memory_space<vmem>>, %arg9: memref<4x1xf32, #tpu.memory_space<vmem>>, %arg10: memref<1x4x256xf32, #tpu.memory_space<vmem>>) attributes {dimension_semantics = [#tpu.dimension_semantics<parallel>], iteration_bounds = array<i64: 2>, scalar_prefetch = 0 : i64, scratch_operands = 0 : i64, tpu.core_type = #tpu.core_type<tc>, window_params = [{transform_indices = @transform_0, window_bounds = array<i64: 1, 4, 256>}, {pipeline_mode = #tpu.pipeline_mode<synchronous>, transform_indices = @transform_1, window_bounds = array<i64: 9, 4, 4>}, {pipeline_mode = #tpu.pipeline_mode<synchronous>, transform_indices = @transform_2, window_bounds = array<i64: 4, 1>}, {pipeline_mode = #tpu.pipeline_mode<synchronous>, transform_indices = @transform_3, window_bounds = array<i64: 9, 4, 4>}, {pipeline_mode = #tpu.pipeline_mode<synchronous>, transform_indices = @transform_4, window_bounds = array<i64: 4, 1>}, {pipeline_mode = #tpu.pipeline_mode<synchronous>, transform_indices = @transform_5, window_bounds = array<i64: 4, 2>}, {pipeline_mode = #tpu.pipeline_mode<synchronous>, transform_indices = @transform_6, window_bounds = array<i64: 1, 2>}, {pipeline_mode = #tpu.pipeline_mode<synchronous>, transform_indices = @transform_7, window_bounds = array<i64: 4, 2>}, {pipeline_mode = #tpu.pipeline_mode<synchronous>, transform_indices = @transform_8, window_bounds = array<i64: 4, 1>}, {transform_indices = @transform_9, window_bounds = array<i64: 1, 4, 256>}]} {
    %c0 = arith.constant 0 : index
    %c0_0 = arith.constant 0 : index
    %c0_1 = arith.constant 0 : index
    %0 = vector.load %arg1[%c0, %c0_0, %c0_1] : memref<1x4x256xf32, #tpu.memory_space<vmem>>, vector<1x4x256xf32>
    %1 = vector.shape_cast %0 : vector<1x4x256xf32> to vector<4x256xf32>
    %2 = tpu.iota {dimensions = array<i32: 1>} : vector<1x256xi32>
    %c15_i32 = arith.constant 15 : i32
    %3 = vector.broadcast %c15_i32 : i32 to vector<1x256xi32>
    %4 = arith.andi %2, %3 : vector<1x256xi32>
    %c15_i32_2 = arith.constant 15 : i32
    %5 = vector.broadcast %c15_i32_2 : i32 to vector<1x256xi32>
    %6 = arith.cmpi slt, %4, %5 : vector<1x256xi32>
    %cst = arith.constant 1.000000e+00 : f32
    %cst_3 = arith.constant 0.000000e+00 : f32
    %7 = vector.broadcast %cst : f32 to vector<1x256xf32>
    %8 = vector.broadcast %cst_3 : f32 to vector<1x256xf32>
    %9 = arith.select %6, %7, %8 : vector<1x256xi1>, vector<1x256xf32>
    %c1_i32 = arith.constant 1 : i32
    %10 = vector.broadcast %c1_i32 : i32 to vector<1x256xi32>
    %11 = arith.cmpi sge, %4, %10 : vector<1x256xi32>
    %cst_4 = arith.constant 1.000000e+00 : f32
    %cst_5 = arith.constant 0.000000e+00 : f32
    %12 = vector.broadcast %cst_4 : f32 to vector<1x256xf32>
    %13 = vector.broadcast %cst_5 : f32 to vector<1x256xf32>
    %14 = arith.select %11, %12, %13 : vector<1x256xi1>, vector<1x256xf32>
    %cst_6 = arith.constant 0.000000e+00 : f32
    %15 = vector.broadcast %cst_6 : f32 to vector<4x256xf32>
    %cst_7 = arith.constant 0.000000e+00 : f32
    %16 = vector.broadcast %cst_7 : f32 to vector<4x17xf32>
    %17 = vector.extract_strided_slice %1 {offsets = [0, 0], sizes = [4, 239], strides = [1, 1]} : vector<4x256xf32> to vector<4x239xf32>
    %18 = tpu.concatenate %16, %17 in 1 : vector<4x17xf32>, vector<4x239xf32> -> vector<4x256xf32>
    %19 = vector.broadcast %14 : vector<1x256xf32> to vector<4x256xf32>
    %20 = arith.mulf %18, %19 : vector<4x256xf32>
    %c0_8 = arith.constant 0 : index
    %c0_9 = arith.constant 0 : index
    %c0_10 = arith.constant 0 : index
    %21 = vector.load %arg2[%c0_8, %c0_9, %c0_10] : memref<9x4x4xf32, #tpu.memory_space<vmem>>, vector<1x4x4xf32>
    %22 = vector.shape_cast %21 : vector<1x4x4xf32> to vector<4x4xf32>
    %cst_11 = arith.constant dense<0.000000e+00> : vector<4x256xf32>
    %23 = tpu.matmul %22, %20, %cst_11 {dimension_numbers = #tpu.dot_dimension_numbers<[1], [0], [0], [1], [0, 0, 1, 1], [], []>} : vector<4x4xf32>, vector<4x256xf32>, vector<4x256xf32> -> vector<4x256xf32>
    %24 = arith.addf %15, %23 : vector<4x256xf32>
    %cst_12 = arith.constant 0.000000e+00 : f32
    %25 = vector.broadcast %cst_12 : f32 to vector<4x16xf32>
    %26 = vector.extract_strided_slice %1 {offsets = [0, 0], sizes = [4, 240], strides = [1, 1]} : vector<4x256xf32> to vector<4x240xf32>
    %27 = tpu.concatenate %25, %26 in 1 : vector<4x16xf32>, vector<4x240xf32> -> vector<4x256xf32>
    %c1 = arith.constant 1 : index
    %c0_13 = arith.constant 0 : index
    %c0_14 = arith.constant 0 : index
    %28 = vector.load %arg2[%c1, %c0_13, %c0_14] : memref<9x4x4xf32, #tpu.memory_space<vmem>>, vector<1x4x4xf32>
    %29 = vector.shape_cast %28 : vector<1x4x4xf32> to vector<4x4xf32>
    %cst_15 = arith.constant dense<0.000000e+00> : vector<4x256xf32>
    %30 = tpu.matmul %29, %27, %cst_15 {dimension_numbers = #tpu.dot_dimension_numbers<[1], [0], [0], [1], [0, 0, 1, 1], [], []>} : vector<4x4xf32>, vector<4x256xf32>, vector<4x256xf32> -> vector<4x256xf32>
    %31 = arith.addf %24, %30 : vector<4x256xf32>
    %cst_16 = arith.constant 0.000000e+00 : f32
    %32 = vector.broadcast %cst_16 : f32 to vector<4x15xf32>
    %33 = vector.extract_strided_slice %1 {offsets = [0, 0], sizes = [4, 241], strides = [1, 1]} : vector<4x256xf32> to vector<4x241xf32>
    %34 = tpu.concatenate %32, %33 in 1 : vector<4x15xf32>, vector<4x241xf32> -> vector<4x256xf32>
    %35 = vector.broadcast %9 : vector<1x256xf32> to vector<4x256xf32>
    %36 = arith.mulf %34, %35 : vector<4x256xf32>
    %c2 = arith.constant 2 : index
    %c0_17 = arith.constant 0 : index
    %c0_18 = arith.constant 0 : index
    %37 = vector.load %arg2[%c2, %c0_17, %c0_18] : memref<9x4x4xf32, #tpu.memory_space<vmem>>, vector<1x4x4xf32>
    %38 = vector.shape_cast %37 : vector<1x4x4xf32> to vector<4x4xf32>
    %cst_19 = arith.constant dense<0.000000e+00> : vector<4x256xf32>
    %39 = tpu.matmul %38, %36, %cst_19 {dimension_numbers = #tpu.dot_dimension_numbers<[1], [0], [0], [1], [0, 0, 1, 1], [], []>} : vector<4x4xf32>, vector<4x256xf32>, vector<4x256xf32> -> vector<4x256xf32>
    %40 = arith.addf %31, %39 : vector<4x256xf32>
    %cst_20 = arith.constant 0.000000e+00 : f32
    %41 = vector.broadcast %cst_20 : f32 to vector<4x1xf32>
    %42 = vector.extract_strided_slice %1 {offsets = [0, 0], sizes = [4, 255], strides = [1, 1]} : vector<4x256xf32> to vector<4x255xf32>
    %43 = tpu.concatenate %41, %42 in 1 : vector<4x1xf32>, vector<4x255xf32> -> vector<4x256xf32>
    %44 = vector.broadcast %14 : vector<1x256xf32> to vector<4x256xf32>
    %45 = arith.mulf %43, %44 : vector<4x256xf32>
    %c3 = arith.constant 3 : index
    %c0_21 = arith.constant 0 : index
    %c0_22 = arith.constant 0 : index
    %46 = vector.load %arg2[%c3, %c0_21, %c0_22] : memref<9x4x4xf32, #tpu.memory_space<vmem>>, vector<1x4x4xf32>
    %47 = vector.shape_cast %46 : vector<1x4x4xf32> to vector<4x4xf32>
    %cst_23 = arith.constant dense<0.000000e+00> : vector<4x256xf32>
    %48 = tpu.matmul %47, %45, %cst_23 {dimension_numbers = #tpu.dot_dimension_numbers<[1], [0], [0], [1], [0, 0, 1, 1], [], []>} : vector<4x4xf32>, vector<4x256xf32>, vector<4x256xf32> -> vector<4x256xf32>
    %49 = arith.addf %40, %48 : vector<4x256xf32>
    %c4 = arith.constant 4 : index
    %c0_24 = arith.constant 0 : index
    %c0_25 = arith.constant 0 : index
    %50 = vector.load %arg2[%c4, %c0_24, %c0_25] : memref<9x4x4xf32, #tpu.memory_space<vmem>>, vector<1x4x4xf32>
    %51 = vector.shape_cast %50 : vector<1x4x4xf32> to vector<4x4xf32>
    %cst_26 = arith.constant dense<0.000000e+00> : vector<4x256xf32>
    %52 = tpu.matmul %51, %1, %cst_26 {dimension_numbers = #tpu.dot_dimension_numbers<[1], [0], [0], [1], [0, 0, 1, 1], [], []>} : vector<4x4xf32>, vector<4x256xf32>, vector<4x256xf32> -> vector<4x256xf32>
    %53 = arith.addf %49, %52 : vector<4x256xf32>
    %cst_27 = arith.constant 0.000000e+00 : f32
    %54 = vector.broadcast %cst_27 : f32 to vector<4x1xf32>
    %55 = vector.extract_strided_slice %1 {offsets = [0, 1], sizes = [4, 255], strides = [1, 1]} : vector<4x256xf32> to vector<4x255xf32>
    %56 = tpu.concatenate %55, %54 in 1 : vector<4x255xf32>, vector<4x1xf32> -> vector<4x256xf32>
    %57 = vector.broadcast %9 : vector<1x256xf32> to vector<4x256xf32>
    %58 = arith.mulf %56, %57 : vector<4x256xf32>
    %c5 = arith.constant 5 : index
    %c0_28 = arith.constant 0 : index
    %c0_29 = arith.constant 0 : index
    %59 = vector.load %arg2[%c5, %c0_28, %c0_29] : memref<9x4x4xf32, #tpu.memory_space<vmem>>, vector<1x4x4xf32>
    %60 = vector.shape_cast %59 : vector<1x4x4xf32> to vector<4x4xf32>
    %cst_30 = arith.constant dense<0.000000e+00> : vector<4x256xf32>
    %61 = tpu.matmul %60, %58, %cst_30 {dimension_numbers = #tpu.dot_dimension_numbers<[1], [0], [0], [1], [0, 0, 1, 1], [], []>} : vector<4x4xf32>, vector<4x256xf32>, vector<4x256xf32> -> vector<4x256xf32>
    %62 = arith.addf %53, %61 : vector<4x256xf32>
    %cst_31 = arith.constant 0.000000e+00 : f32
    %63 = vector.broadcast %cst_31 : f32 to vector<4x15xf32>
    %64 = vector.extract_strided_slice %1 {offsets = [0, 15], sizes = [4, 241], strides = [1, 1]} : vector<4x256xf32> to vector<4x241xf32>
    %65 = tpu.concatenate %64, %63 in 1 : vector<4x241xf32>, vector<4x15xf32> -> vector<4x256xf32>
    %66 = vector.broadcast %14 : vector<1x256xf32> to vector<4x256xf32>
    %67 = arith.mulf %65, %66 : vector<4x256xf32>
    %c6 = arith.constant 6 : index
    %c0_32 = arith.constant 0 : index
    %c0_33 = arith.constant 0 : index
    %68 = vector.load %arg2[%c6, %c0_32, %c0_33] : memref<9x4x4xf32, #tpu.memory_space<vmem>>, vector<1x4x4xf32>
    %69 = vector.shape_cast %68 : vector<1x4x4xf32> to vector<4x4xf32>
    %cst_34 = arith.constant dense<0.000000e+00> : vector<4x256xf32>
    %70 = tpu.matmul %69, %67, %cst_34 {dimension_numbers = #tpu.dot_dimension_numbers<[1], [0], [0], [1], [0, 0, 1, 1], [], []>} : vector<4x4xf32>, vector<4x256xf32>, vector<4x256xf32> -> vector<4x256xf32>
    %71 = arith.addf %62, %70 : vector<4x256xf32>
    %cst_35 = arith.constant 0.000000e+00 : f32
    %72 = vector.broadcast %cst_35 : f32 to vector<4x16xf32>
    %73 = vector.extract_strided_slice %1 {offsets = [0, 16], sizes = [4, 240], strides = [1, 1]} : vector<4x256xf32> to vector<4x240xf32>
    %74 = tpu.concatenate %73, %72 in 1 : vector<4x240xf32>, vector<4x16xf32> -> vector<4x256xf32>
    %c7 = arith.constant 7 : index
    %c0_36 = arith.constant 0 : index
    %c0_37 = arith.constant 0 : index
    %75 = vector.load %arg2[%c7, %c0_36, %c0_37] : memref<9x4x4xf32, #tpu.memory_space<vmem>>, vector<1x4x4xf32>
    %76 = vector.shape_cast %75 : vector<1x4x4xf32> to vector<4x4xf32>
    %cst_38 = arith.constant dense<0.000000e+00> : vector<4x256xf32>
    %77 = tpu.matmul %76, %74, %cst_38 {dimension_numbers = #tpu.dot_dimension_numbers<[1], [0], [0], [1], [0, 0, 1, 1], [], []>} : vector<4x4xf32>, vector<4x256xf32>, vector<4x256xf32> -> vector<4x256xf32>
    %78 = arith.addf %71, %77 : vector<4x256xf32>
    %cst_39 = arith.constant 0.000000e+00 : f32
    %79 = vector.broadcast %cst_39 : f32 to vector<4x17xf32>
    %80 = vector.extract_strided_slice %1 {offsets = [0, 17], sizes = [4, 239], strides = [1, 1]} : vector<4x256xf32> to vector<4x239xf32>
    %81 = tpu.concatenate %80, %79 in 1 : vector<4x239xf32>, vector<4x17xf32> -> vector<4x256xf32>
    %82 = vector.broadcast %9 : vector<1x256xf32> to vector<4x256xf32>
    %83 = arith.mulf %81, %82 : vector<4x256xf32>
    %c8 = arith.constant 8 : index
    %c0_40 = arith.constant 0 : index
    %c0_41 = arith.constant 0 : index
    %84 = vector.load %arg2[%c8, %c0_40, %c0_41] : memref<9x4x4xf32, #tpu.memory_space<vmem>>, vector<1x4x4xf32>
    %85 = vector.shape_cast %84 : vector<1x4x4xf32> to vector<4x4xf32>
    %cst_42 = arith.constant dense<0.000000e+00> : vector<4x256xf32>
    %86 = tpu.matmul %85, %83, %cst_42 {dimension_numbers = #tpu.dot_dimension_numbers<[1], [0], [0], [1], [0, 0, 1, 1], [], []>} : vector<4x4xf32>, vector<4x256xf32>, vector<4x256xf32> -> vector<4x256xf32>
    %87 = arith.addf %78, %86 : vector<4x256xf32>
    %c0_43 = arith.constant 0 : index
    %c0_44 = arith.constant 0 : index
    %88 = vector.load %arg3[%c0_43, %c0_44] : memref<4x1xf32, #tpu.memory_space<vmem>>, vector<4x1xf32>
    %89 = vector.broadcast %88 : vector<4x1xf32> to vector<4x256xf32>
    %90 = arith.addf %87, %89 : vector<4x256xf32>
    %cst_45 = arith.constant 0.000000e+00 : f32
    %91 = vector.broadcast %cst_45 : f32 to vector<4x256xf32>
    %92 = arith.maximumf %90, %91 : vector<4x256xf32>
    %cst_46 = arith.constant 0.000000e+00 : f32
    %93 = vector.broadcast %cst_46 : f32 to vector<4x256xf32>
    %cst_47 = arith.constant 0.000000e+00 : f32
    %94 = vector.broadcast %cst_47 : f32 to vector<4x17xf32>
    %95 = vector.extract_strided_slice %92 {offsets = [0, 0], sizes = [4, 239], strides = [1, 1]} : vector<4x256xf32> to vector<4x239xf32>
    %96 = tpu.concatenate %94, %95 in 1 : vector<4x17xf32>, vector<4x239xf32> -> vector<4x256xf32>
    %97 = vector.broadcast %14 : vector<1x256xf32> to vector<4x256xf32>
    %98 = arith.mulf %96, %97 : vector<4x256xf32>
    %c0_48 = arith.constant 0 : index
    %c0_49 = arith.constant 0 : index
    %c0_50 = arith.constant 0 : index
    %99 = vector.load %arg4[%c0_48, %c0_49, %c0_50] : memref<9x4x4xf32, #tpu.memory_space<vmem>>, vector<1x4x4xf32>
    %100 = vector.shape_cast %99 : vector<1x4x4xf32> to vector<4x4xf32>
    %cst_51 = arith.constant dense<0.000000e+00> : vector<4x256xf32>
    %101 = tpu.matmul %100, %98, %cst_51 {dimension_numbers = #tpu.dot_dimension_numbers<[1], [0], [0], [1], [0, 0, 1, 1], [], []>} : vector<4x4xf32>, vector<4x256xf32>, vector<4x256xf32> -> vector<4x256xf32>
    %102 = arith.addf %93, %101 : vector<4x256xf32>
    %cst_52 = arith.constant 0.000000e+00 : f32
    %103 = vector.broadcast %cst_52 : f32 to vector<4x16xf32>
    %104 = vector.extract_strided_slice %92 {offsets = [0, 0], sizes = [4, 240], strides = [1, 1]} : vector<4x256xf32> to vector<4x240xf32>
    %105 = tpu.concatenate %103, %104 in 1 : vector<4x16xf32>, vector<4x240xf32> -> vector<4x256xf32>
    %c1_53 = arith.constant 1 : index
    %c0_54 = arith.constant 0 : index
    %c0_55 = arith.constant 0 : index
    %106 = vector.load %arg4[%c1_53, %c0_54, %c0_55] : memref<9x4x4xf32, #tpu.memory_space<vmem>>, vector<1x4x4xf32>
    %107 = vector.shape_cast %106 : vector<1x4x4xf32> to vector<4x4xf32>
    %cst_56 = arith.constant dense<0.000000e+00> : vector<4x256xf32>
    %108 = tpu.matmul %107, %105, %cst_56 {dimension_numbers = #tpu.dot_dimension_numbers<[1], [0], [0], [1], [0, 0, 1, 1], [], []>} : vector<4x4xf32>, vector<4x256xf32>, vector<4x256xf32> -> vector<4x256xf32>
    %109 = arith.addf %102, %108 : vector<4x256xf32>
    %cst_57 = arith.constant 0.000000e+00 : f32
    %110 = vector.broadcast %cst_57 : f32 to vector<4x15xf32>
    %111 = vector.extract_strided_slice %92 {offsets = [0, 0], sizes = [4, 241], strides = [1, 1]} : vector<4x256xf32> to vector<4x241xf32>
    %112 = tpu.concatenate %110, %111 in 1 : vector<4x15xf32>, vector<4x241xf32> -> vector<4x256xf32>
    %113 = vector.broadcast %9 : vector<1x256xf32> to vector<4x256xf32>
    %114 = arith.mulf %112, %113 : vector<4x256xf32>
    %c2_58 = arith.constant 2 : index
    %c0_59 = arith.constant 0 : index
    %c0_60 = arith.constant 0 : index
    %115 = vector.load %arg4[%c2_58, %c0_59, %c0_60] : memref<9x4x4xf32, #tpu.memory_space<vmem>>, vector<1x4x4xf32>
    %116 = vector.shape_cast %115 : vector<1x4x4xf32> to vector<4x4xf32>
    %cst_61 = arith.constant dense<0.000000e+00> : vector<4x256xf32>
    %117 = tpu.matmul %116, %114, %cst_61 {dimension_numbers = #tpu.dot_dimension_numbers<[1], [0], [0], [1], [0, 0, 1, 1], [], []>} : vector<4x4xf32>, vector<4x256xf32>, vector<4x256xf32> -> vector<4x256xf32>
    %118 = arith.addf %109, %117 : vector<4x256xf32>
    %cst_62 = arith.constant 0.000000e+00 : f32
    %119 = vector.broadcast %cst_62 : f32 to vector<4x1xf32>
    %120 = vector.extract_strided_slice %92 {offsets = [0, 0], sizes = [4, 255], strides = [1, 1]} : vector<4x256xf32> to vector<4x255xf32>
    %121 = tpu.concatenate %119, %120 in 1 : vector<4x1xf32>, vector<4x255xf32> -> vector<4x256xf32>
    %122 = vector.broadcast %14 : vector<1x256xf32> to vector<4x256xf32>
    %123 = arith.mulf %121, %122 : vector<4x256xf32>
    %c3_63 = arith.constant 3 : index
    %c0_64 = arith.constant 0 : index
    %c0_65 = arith.constant 0 : index
    %124 = vector.load %arg4[%c3_63, %c0_64, %c0_65] : memref<9x4x4xf32, #tpu.memory_space<vmem>>, vector<1x4x4xf32>
    %125 = vector.shape_cast %124 : vector<1x4x4xf32> to vector<4x4xf32>
    %cst_66 = arith.constant dense<0.000000e+00> : vector<4x256xf32>
    %126 = tpu.matmul %125, %123, %cst_66 {dimension_numbers = #tpu.dot_dimension_numbers<[1], [0], [0], [1], [0, 0, 1, 1], [], []>} : vector<4x4xf32>, vector<4x256xf32>, vector<4x256xf32> -> vector<4x256xf32>
    %127 = arith.addf %118, %126 : vector<4x256xf32>
    %c4_67 = arith.constant 4 : index
    %c0_68 = arith.constant 0 : index
    %c0_69 = arith.constant 0 : index
    %128 = vector.load %arg4[%c4_67, %c0_68, %c0_69] : memref<9x4x4xf32, #tpu.memory_space<vmem>>, vector<1x4x4xf32>
    %129 = vector.shape_cast %128 : vector<1x4x4xf32> to vector<4x4xf32>
    %cst_70 = arith.constant dense<0.000000e+00> : vector<4x256xf32>
    %130 = tpu.matmul %129, %92, %cst_70 {dimension_numbers = #tpu.dot_dimension_numbers<[1], [0], [0], [1], [0, 0, 1, 1], [], []>} : vector<4x4xf32>, vector<4x256xf32>, vector<4x256xf32> -> vector<4x256xf32>
    %131 = arith.addf %127, %130 : vector<4x256xf32>
    %cst_71 = arith.constant 0.000000e+00 : f32
    %132 = vector.broadcast %cst_71 : f32 to vector<4x1xf32>
    %133 = vector.extract_strided_slice %92 {offsets = [0, 1], sizes = [4, 255], strides = [1, 1]} : vector<4x256xf32> to vector<4x255xf32>
    %134 = tpu.concatenate %133, %132 in 1 : vector<4x255xf32>, vector<4x1xf32> -> vector<4x256xf32>
    %135 = vector.broadcast %9 : vector<1x256xf32> to vector<4x256xf32>
    %136 = arith.mulf %134, %135 : vector<4x256xf32>
    %c5_72 = arith.constant 5 : index
    %c0_73 = arith.constant 0 : index
    %c0_74 = arith.constant 0 : index
    %137 = vector.load %arg4[%c5_72, %c0_73, %c0_74] : memref<9x4x4xf32, #tpu.memory_space<vmem>>, vector<1x4x4xf32>
    %138 = vector.shape_cast %137 : vector<1x4x4xf32> to vector<4x4xf32>
    %cst_75 = arith.constant dense<0.000000e+00> : vector<4x256xf32>
    %139 = tpu.matmul %138, %136, %cst_75 {dimension_numbers = #tpu.dot_dimension_numbers<[1], [0], [0], [1], [0, 0, 1, 1], [], []>} : vector<4x4xf32>, vector<4x256xf32>, vector<4x256xf32> -> vector<4x256xf32>
    %140 = arith.addf %131, %139 : vector<4x256xf32>
    %cst_76 = arith.constant 0.000000e+00 : f32
    %141 = vector.broadcast %cst_76 : f32 to vector<4x15xf32>
    %142 = vector.extract_strided_slice %92 {offsets = [0, 15], sizes = [4, 241], strides = [1, 1]} : vector<4x256xf32> to vector<4x241xf32>
    %143 = tpu.concatenate %142, %141 in 1 : vector<4x241xf32>, vector<4x15xf32> -> vector<4x256xf32>
    %144 = vector.broadcast %14 : vector<1x256xf32> to vector<4x256xf32>
    %145 = arith.mulf %143, %144 : vector<4x256xf32>
    %c6_77 = arith.constant 6 : index
    %c0_78 = arith.constant 0 : index
    %c0_79 = arith.constant 0 : index
    %146 = vector.load %arg4[%c6_77, %c0_78, %c0_79] : memref<9x4x4xf32, #tpu.memory_space<vmem>>, vector<1x4x4xf32>
    %147 = vector.shape_cast %146 : vector<1x4x4xf32> to vector<4x4xf32>
    %cst_80 = arith.constant dense<0.000000e+00> : vector<4x256xf32>
    %148 = tpu.matmul %147, %145, %cst_80 {dimension_numbers = #tpu.dot_dimension_numbers<[1], [0], [0], [1], [0, 0, 1, 1], [], []>} : vector<4x4xf32>, vector<4x256xf32>, vector<4x256xf32> -> vector<4x256xf32>
    %149 = arith.addf %140, %148 : vector<4x256xf32>
    %cst_81 = arith.constant 0.000000e+00 : f32
    %150 = vector.broadcast %cst_81 : f32 to vector<4x16xf32>
    %151 = vector.extract_strided_slice %92 {offsets = [0, 16], sizes = [4, 240], strides = [1, 1]} : vector<4x256xf32> to vector<4x240xf32>
    %152 = tpu.concatenate %151, %150 in 1 : vector<4x240xf32>, vector<4x16xf32> -> vector<4x256xf32>
    %c7_82 = arith.constant 7 : index
    %c0_83 = arith.constant 0 : index
    %c0_84 = arith.constant 0 : index
    %153 = vector.load %arg4[%c7_82, %c0_83, %c0_84] : memref<9x4x4xf32, #tpu.memory_space<vmem>>, vector<1x4x4xf32>
    %154 = vector.shape_cast %153 : vector<1x4x4xf32> to vector<4x4xf32>
    %cst_85 = arith.constant dense<0.000000e+00> : vector<4x256xf32>
    %155 = tpu.matmul %154, %152, %cst_85 {dimension_numbers = #tpu.dot_dimension_numbers<[1], [0], [0], [1], [0, 0, 1, 1], [], []>} : vector<4x4xf32>, vector<4x256xf32>, vector<4x256xf32> -> vector<4x256xf32>
    %156 = arith.addf %149, %155 : vector<4x256xf32>
    %cst_86 = arith.constant 0.000000e+00 : f32
    %157 = vector.broadcast %cst_86 : f32 to vector<4x17xf32>
    %158 = vector.extract_strided_slice %92 {offsets = [0, 17], sizes = [4, 239], strides = [1, 1]} : vector<4x256xf32> to vector<4x239xf32>
    %159 = tpu.concatenate %158, %157 in 1 : vector<4x239xf32>, vector<4x17xf32> -> vector<4x256xf32>
    %160 = vector.broadcast %9 : vector<1x256xf32> to vector<4x256xf32>
    %161 = arith.mulf %159, %160 : vector<4x256xf32>
    %c8_87 = arith.constant 8 : index
    %c0_88 = arith.constant 0 : index
    %c0_89 = arith.constant 0 : index
    %162 = vector.load %arg4[%c8_87, %c0_88, %c0_89] : memref<9x4x4xf32, #tpu.memory_space<vmem>>, vector<1x4x4xf32>
    %163 = vector.shape_cast %162 : vector<1x4x4xf32> to vector<4x4xf32>
    %cst_90 = arith.constant dense<0.000000e+00> : vector<4x256xf32>
    %164 = tpu.matmul %163, %161, %cst_90 {dimension_numbers = #tpu.dot_dimension_numbers<[1], [0], [0], [1], [0, 0, 1, 1], [], []>} : vector<4x4xf32>, vector<4x256xf32>, vector<4x256xf32> -> vector<4x256xf32>
    %165 = arith.addf %156, %164 : vector<4x256xf32>
    %c0_91 = arith.constant 0 : index
    %c0_92 = arith.constant 0 : index
    %166 = vector.load %arg5[%c0_91, %c0_92] : memref<4x1xf32, #tpu.memory_space<vmem>>, vector<4x1xf32>
    %167 = vector.broadcast %166 : vector<4x1xf32> to vector<4x256xf32>
    %168 = arith.addf %165, %167 : vector<4x256xf32>
    %cst_93 = arith.constant dense<0.000000e+00> : vector<4xf32>
    %169 = vector.multi_reduction <add>, %168, %cst_93 [1] : vector<4x256xf32> to vector<4xf32>
    %170 = vector.shape_cast %169 : vector<4xf32> to vector<4x1xf32>
    %cst_94 = arith.constant 3.906250e-03 : f32
    %171 = vector.broadcast %cst_94 : f32 to vector<4x1xf32>
    %172 = arith.mulf %170, %171 : vector<4x1xf32>
    %c0_95 = arith.constant 0 : index
    %c0_96 = arith.constant 0 : index
    %173 = vector.load %arg6[%c0_95, %c0_96] : memref<4x2xf32, #tpu.memory_space<vmem>>, vector<4x2xf32>
    %174 = vector.broadcast %172 : vector<4x1xf32> to vector<4x2xf32>
    %175 = arith.mulf %173, %174 : vector<4x2xf32>
    %cst_97 = arith.constant dense<0.000000e+00> : vector<2xf32>
    %176 = vector.multi_reduction <add>, %175, %cst_97 [0] : vector<4x2xf32> to vector<2xf32>
    %177 = vector.shape_cast %176 : vector<2xf32> to vector<1x2xf32>
    %c0_98 = arith.constant 0 : index
    %c0_99 = arith.constant 0 : index
    %178 = vector.load %arg7[%c0_98, %c0_99] : memref<1x2xf32, #tpu.memory_space<vmem>>, vector<1x2xf32>
    %179 = arith.addf %177, %178 : vector<1x2xf32>
    %cst_100 = arith.constant 0.000000e+00 : f32
    %180 = vector.broadcast %cst_100 : f32 to vector<1x2xf32>
    %181 = arith.maximumf %179, %180 : vector<1x2xf32>
    %c0_101 = arith.constant 0 : index
    %c0_102 = arith.constant 0 : index
    %182 = vector.load %arg8[%c0_101, %c0_102] : memref<4x2xf32, #tpu.memory_space<vmem>>, vector<4x2xf32>
    %183 = vector.broadcast %181 : vector<1x2xf32> to vector<4x2xf32>
    %184 = arith.mulf %182, %183 : vector<4x2xf32>
    %cst_103 = arith.constant dense<0.000000e+00> : vector<4xf32>
    %185 = vector.multi_reduction <add>, %184, %cst_103 [1] : vector<4x2xf32> to vector<4xf32>
    %186 = vector.shape_cast %185 : vector<4xf32> to vector<4x1xf32>
    %c0_104 = arith.constant 0 : index
    %c0_105 = arith.constant 0 : index
    %187 = vector.load %arg9[%c0_104, %c0_105] : memref<4x1xf32, #tpu.memory_space<vmem>>, vector<4x1xf32>
    %188 = arith.addf %186, %187 : vector<4x1xf32>
    %cst_106 = arith.constant 0.000000e+00 : f32
    %189 = vector.broadcast %cst_106 : f32 to vector<4x1xf32>
    %190 = arith.subf %189, %188 : vector<4x1xf32>
    %191 = math.exp %190 : vector<4x1xf32>
    %cst_107 = arith.constant 1.000000e+00 : f32
    %192 = vector.broadcast %cst_107 : f32 to vector<4x1xf32>
    %193 = arith.addf %192, %191 : vector<4x1xf32>
    %cst_108 = arith.constant 1.000000e+00 : f32
    %194 = vector.broadcast %cst_108 : f32 to vector<4x1xf32>
    %195 = arith.divf %194, %193 : vector<4x1xf32>
    %196 = arith.mulf %195, %172 : vector<4x1xf32>
    %197 = vector.broadcast %196 : vector<4x1xf32> to vector<4x256xf32>
    %198 = arith.addf %1, %197 : vector<4x256xf32>
    %c0_109 = arith.constant 0 : index
    %c0_110 = arith.constant 0 : index
    %c0_111 = arith.constant 0 : index
    %199 = vector.load %arg10[%c0_109, %c0_110, %c0_111] : memref<1x4x256xf32, #tpu.memory_space<vmem>>, vector<1x4x256xf32>
    %200 = vector.shape_cast %199 : vector<1x4x256xf32> to vector<4x256xf32>
    %201 = vector.shape_cast %198 : vector<4x256xf32> to vector<1x4x256xf32>
    tpu.vector_store %arg10[%c0_109, %c0_110, %c0_111], %201 {strides = array<i32>} : memref<1x4x256xf32, #tpu.memory_space<vmem>>, vector<1x4x256xf32>,
    return
  }
  func.func @transform_0(%arg0: i32) -> (i32, i32, i32) {
    %c0_i32 = arith.constant 0 : i32
    %c0_i32_0 = arith.constant 0 : i32
    %c0_i32_1 = arith.constant 0 : i32
    return %arg0, %c0_i32, %c0_i32_0 : i32, i32, i32
  }
  func.func @transform_1(%arg0: i32) -> (i32, i32, i32) {
    %c0_i32 = arith.constant 0 : i32
    %c0_i32_0 = arith.constant 0 : i32
    %c0_i32_1 = arith.constant 0 : i32
    %c0_i32_2 = arith.constant 0 : i32
    return %c0_i32, %c0_i32_0, %c0_i32_1 : i32, i32, i32
  }
  func.func @transform_2(%arg0: i32) -> (i32, i32) {
    %c0_i32 = arith.constant 0 : i32
    %c0_i32_0 = arith.constant 0 : i32
    %c0_i32_1 = arith.constant 0 : i32
    return %c0_i32, %c0_i32_0 : i32, i32
  }
  func.func @transform_3(%arg0: i32) -> (i32, i32, i32) {
    %c0_i32 = arith.constant 0 : i32
    %c0_i32_0 = arith.constant 0 : i32
    %c0_i32_1 = arith.constant 0 : i32
    %c0_i32_2 = arith.constant 0 : i32
    return %c0_i32, %c0_i32_0, %c0_i32_1 : i32, i32, i32
  }
  func.func @transform_4(%arg0: i32) -> (i32, i32) {
    %c0_i32 = arith.constant 0 : i32
    %c0_i32_0 = arith.constant 0 : i32
    %c0_i32_1 = arith.constant 0 : i32
    return %c0_i32, %c0_i32_0 : i32, i32
  }
  func.func @transform_5(%arg0: i32) -> (i32, i32) {
    %c0_i32 = arith.constant 0 : i32
    %c0_i32_0 = arith.constant 0 : i32
    %c0_i32_1 = arith.constant 0 : i32
    return %c0_i32, %c0_i32_0 : i32, i32
  }
  func.func @transform_6(%arg0: i32) -> (i32, i32) {
    %c0_i32 = arith.constant 0 : i32
    %c0_i32_0 = arith.constant 0 : i32
    %c0_i32_1 = arith.constant 0 : i32
    return %c0_i32, %c0_i32_0 : i32, i32
  }
  func.func @transform_7(%arg0: i32) -> (i32, i32) {
    %c0_i32 = arith.constant 0 : i32
    %c0_i32_0 = arith.constant 0 : i32
    %c0_i32_1 = arith.constant 0 : i32
    return %c0_i32, %c0_i32_0 : i32, i32
  }
  func.func @transform_8(%arg0: i32) -> (i32, i32) {
    %c0_i32 = arith.constant 0 : i32
    %c0_i32_0 = arith.constant 0 : i32
    %c0_i32_1 = arith.constant 0 : i32
    return %c0_i32, %c0_i32_0 : i32, i32
  }
  func.func @transform_9(%arg0: i32) -> (i32, i32, i32) {
    %c0_i32 = arith.constant 0 : i32
    %c0_i32_0 = arith.constant 0 : i32
    %c0_i32_1 = arith.constant 0 : i32
    return %arg0, %c0_i32, %c0_i32_0 : i32, i32, i32
  }
}

</mosaic_0001>

<bundles_post_ra>
// kernel: tpu_custom_call.1
= control target key start
LH: loop header
LB: loop body
LE: loop exit
PB: predicated region body
PF: predicated region fallthrough
CT: control target
= control target key end

     0   :  { %14 = vsyncpa [#allocation3], 0  ;;  %s2828_s0 = inlined_call_operand.vmem [shape: f32[2,4,256], index: 0, kind: input, shape index: {}]   ;;  %s2829_s1 = inlined_call_operand.vmem [shape: f32[9,4,4], index: 1, kind: input, shape index: {}]   ;;  %s2830_s2 = inlined_call_operand.vmem [shape: f32[4,1], index: 2, kind: input, shape index: {}]   ;;  %s2831_s3 = inlined_call_operand.vmem [shape: f32[9,4,4], index: 3, kind: input, shape index: {}]   ;;  %s2832_s4 = inlined_call_operand.vmem [shape: f32[4,1], index: 4, kind: input, shape index: {}]   ;;  %s2833_s5 = inlined_call_operand.vmem [shape: f32[4,2], index: 5, kind: input, shape index: {}]   ;;  %s2834_s6 = inlined_call_operand.vmem [shape: f32[1,2], index: 6, kind: input, shape index: {}]   ;;  %s2835_s7 = inlined_call_operand.vmem [shape: f32[4,2], index: 7, kind: input, shape index: {}]   ;;  %s2836_s8 = inlined_call_operand.vmem [shape: f32[4,1], index: 8, kind: input, shape index: {}]   ;;  %s2837_s9 = inlined_call_operand.hbm [shape: f32[2,4,256], index: 9, kind: output, shape index: {}]  }
   0x1   :  { %16 = vsyncpa [#allocation3 + $0x1], 0  ;;  %s2442_s30 = smov 0   ;;  %s2444_s10 = smov 0  }
   0x2   :  { %s2446_s11 = smov 0   ;;  %s2448_s12 = smov 0  }
   0x3 LB: > { %s2463_s13 = sadd.s32 4294967295, %s2378_s12   ;;  %s2144_s14 = sadd.s32 4294967294, %s2378_s12   ;;  %s2378_s12 = sphi %s2448_s12, %s2843_s12   ;;  %s2374_s11 = sphi %s2446_s11, %s2842_s11   ;;  %s2370_s10 = sphi %s2444_s10, %s2841_s10   ;;  %s2366_s30 = sphi %s2442_s30, %s2840_s30  }
   0x4   : > { %s2467_s15 = sadd.s32 1, %s2378_s12   ;;  %s223_s16 = sadd.s32 1, %s2374_s11 }
   0x5   : > { %s220_s17 = ssub.s32 %s2378_s12, %s2467_s15  ;;  %p233_p0 = scmp.ne.s32.totalorder %s2374_s11, %s2370_s10 }
   0x6   : > { %p221_p1 = scmp.eq.s32.totalorder %s220_s17, 0  ;;  %p234_p2 = scmp.eq.s32.totalorder %s2463_s13, 1 }
   0x7   : > { %p239_p3 = scmp.ne.s32.totalorder %s2370_s10, %s2366_s30  ;;  %p240_p4 = scmp.eq.s32.totalorder %s2144_s14, 1 }
   0x8   : > { %s2478_s18 = scalar_select %p221_p1, %s2374_s11, %s223_s16  }
   0x9   : > { %p2480_p5 = por %p234_p2, %p233_p0  ;;  %p2484_p6 = por %p240_p4, %p239_p3 }
   0xa   : > { %p2147_p7 = scmp.ge.s32.totalorder %s2378_s12, 1  ;;  %p290_p8 = scmp.lt.s32.totalorder %s2378_s12, 3 }
   0xc   : > { %p291_p9 = pnand %p2147_p7, %p290_p8 }
   0xd   : > { %p326_p10 = scmp.lt.s32.totalorder (!%p291_p9), %s2463_s13, 1  ;;  %v2380_v0 = vmov (!%p291_p9), 0.0   ;;  %s2381_s26 = smov (!%p291_p9), 17   ;;  %v1178_v3 = vld [vmem:[%s2830_s2] sm:$0xf] (!%p291_p9)  ;;  %v2389_v4 = vmov (!%p291_p9), 0   ;;  %v332_v5 = vlaneseq (!%p291_p9) }
   0xe   : > { %294 = sbr.rel (%p291_p9) target bundleno = 1320 (0x528), region = 56  ;;  %443 = vmatprep.mubr.f32.mxu0 (!%p291_p9), %v2380_v0  ;;  %1282 = vmatprep.mubr.f32.mxu1 (!%p291_p9), %v2380_v0  ;;  %s2382_s27 = smov (!%p291_p9), 16   ;;  %vm351_vm1 = vcmask (!%p291_p9), 138240   ;;  %vm363_vm3 = vcmask (!%p291_p9), 130048   ;;  %vm373_vm4 = vcmask (!%p291_p9), 1043456   ;;  %vm369_vm6 = vcmask (!%p291_p9), 31744  }
   0xf   : > { %s2383_s28 = smov (!%p291_p9), 15   ;;  %s2384_s29 = smov (!%p291_p9), 1   ;;  %2310 = vset.pattern.permute.xlu0 (!%p291_p9), %v2389_v4  ;;  %v333_v6 = vand.u32 (!%p291_p9), 127, %v332_v5  ;;  %v2151_v20 = vld [vmem:[%s2829_s1 + $0x4] sm:$0xf] (!%p291_p9)  ;;  %vm534_vm7 = vcmask (!%p291_p9), 121856  }
  0x10   : > { %s2385_s14 = smov (!%p291_p9), 127   ;;  %s2386_s16 = smov (!%p291_p9), 113   ;;  %vm629_vm9 = vcmask (!%p291_p9), 7168   ;;  %v358_v33 = vld [vmem:[%s2829_s1] sm:$0xf] (!%p291_p9)  ;;  %vm806_vm10 = vcmask (!%p291_p9), 1039360  }
  0x11   : > { %s2387_s17 = smov (!%p291_p9), 112   ;;  %v334_v7 = vadd.s32 (!%p291_p9), 128, %v333_v6  ;;  %v335_v8 = vand.u32 (!%p291_p9), 15, %v333_v6  ;;  %v2158_v38 = vld [vmem:[%s2829_s1 + $0x8] sm:$0xf] (!%p291_p9)  ;;  %vm901_vm11 = vcmask (!%p291_p9), 924672  }
  0x12   : > { %v2162_v41 = vld [vmem:[%s2829_s1 + $0xc] sm:$0xf] (!%p291_p9)  ;;  %v2166_v48 = vld [vmem:[%s2829_s1 + $0x10] sm:$0xf] (!%p291_p9)  ;;  %vm996_vm12 = vcmask (!%p291_p9), 916480   ;;  %vm1087_vm13 = vcmask (!%p291_p9), 908288  }
  0x13   : > { %v336_v9 = vand.u32 (!%p291_p9), 15, %v334_v7  ;;  %vm341_vm0 = vcmp.ge.s32.totalorder (!%p291_p9), %v335_v8, 1  ;;  %vm337_vm8 = vcmp.lt.s32.totalorder (!%p291_p9), %v335_v8, 15  ;;  %v2170_v54 = vld [vmem:[%s2829_s1 + $0x14] sm:$0xf] (!%p291_p9)  ;;  %vm2027_vm14 = vcmask (!%p291_p9), 11264  }
  0x14   : > { %v2540_v12 = vsel (!%p291_p9), %vm341_vm0, 1.0, %v2380_v0  ;;  %v2565_v27 = vsel (!%p291_p9), %vm337_vm8, 1.0, %v2380_v0  ;;  %v2174_v59 = vld [vmem:[%s2829_s1 + $0x18] sm:$0xf] (!%p291_p9)  ;;  %v2182_v4 = vld [vmem:[%s2829_s1 + $0x20] sm:$0xf] (!%p291_p9) }
  0x15   : > { %s327_s21 = scalar_select %p326_p10, %s2463_s13, 1  ;;  %vm342_vm2 = vcmp.ge.s32.totalorder %v336_v9, 1  ;;  %vm338_vm5 = vcmp.lt.s32.totalorder %v336_v9, 15 }
  0x16   : > { %v2544_v14 = vsel %vm342_vm2, 1.0, %v2380_v0  ;;  %v2557_v23 = vsel %vm338_vm5, 1.0, %v2380_v0 }
  0x17   : > { %s2226_s22 = sshll.u32 %s327_s21, 3  ;;  %s2388_s21 = smov 111  }
  0x18   : > { %s330_s25 = scalar_lea.vmem %s2828_s0, %s2226_s22 }
  0x19   : > { %v2497_v1 = vld [vmem:[%s330_s25] sm:$0xff] }
  0x1a   : > { %347 = vrot.lane.b32.xlu1 %v2497_v1, %s2381_s26  ;;  %359 = vrot.lane.b32.xlu0 %v2497_v1, %s2382_s27  ;;  %v2505_v2 = vcombine.high %v2497_v1, %v2497_v1 }
  0x1e   : > { %349 = vrot.lane.b32.xlu1 %v2505_v2, %s2381_s26  ;;  %361 = vrot.lane.b32.xlu0 %v2505_v2, %s2382_s27 }
  0x22   : > { %532 = vrot.lane.b32.xlu1 %v2505_v2, %s2383_s28  ;;  %530 = vrot.lane.b32.xlu0 %v2497_v1, %s2383_s28 }
  0x26   : > { %627 = vrot.lane.b32.xlu1 %v2505_v2, %s2384_s29  ;;  %625 = vrot.lane.b32.xlu0 %v2497_v1, %s2384_s29 }
  0x2a   : > { %804 = vrot.lane.b32.xlu0 %v2505_v2, %s2385_s14  ;;  %802 = vrot.lane.b32.xlu1 %v2497_v1, %s2385_s14 }
  0x2e   : > { %899 = vrot.lane.b32.xlu0 %v2505_v2, %s2386_s16  ;;  %897 = vrot.lane.b32.xlu1 %v2497_v1, %s2386_s16 }
  0x32   : > { %994 = vrot.lane.b32.xlu0 %v2505_v2, %s2387_s17  ;;  %992 = vrot.lane.b32.xlu1 %v2497_v1, %s2387_s17 }
  0x36   : > { %1085 = vrot.lane.b32.xlu0 %v2505_v2, %s2388_s21  ;;  %1083 = vrot.lane.b32.xlu1 %v2497_v1, %s2388_s21 }
  0x3a   : > { %1181 = vperm.xlu0 %2310, %v1178_v3   ;;  %v2178_v3 = vld [vmem:[%s2829_s1 + $0x1c] sm:$0xf] }
  0x8c   : > { %v348_v10 = vpop.permute.xlu1 %347  ;;  %v360_v11 = vpop.permute.xlu0 %359 }
  0x8d   : > { %v355_v13 = vsel %vm351_vm1, 0.0, %v348_v10  ;;  %v366_v22 = vsel %vm363_vm3, 0.0, %v360_v11 }
  0x8e   : > { %v356_v17 = vmul.f32 %v355_v13, %v2540_v12 }
  0x90   : > { %v350_v15 = vpop.permute.xlu1 %349  ;;  %v362_v16 = vpop.permute.xlu0 %361 }
  0x91   : > { %v352_v18 = vsel %vm351_vm1, %v348_v10, %v350_v15  ;;  %v364_v19 = vsel %vm363_vm3, %v360_v11, %v362_v16  ;;  %v2011_v15 = vld [vmem:[%s2832_s4] sm:$0xf] }
  0x92   : > { %v357_v21 = vmul.f32 %v352_v18, %v2544_v14  ;;  %2152 = vmatprep.subr.msk.mxu0 %vm373_vm4, %v364_v19 }
  0x93   : > { %2153 = vmatpush1.msk.msra.mxu0 %vm373_vm4, %v366_v22 }
  0x94   : > { %2154 = vmatmul.mubr.msk.f32.vlgmr.msra.gmra.mrb[0].mxu0 %vm369_vm6, %v2151_v20  ;;  %2155 = vmatprep.subr.msk.mxu0 %vm373_vm4, %v357_v21  ;;  %v533_v24 = vpop.permute.xlu1 %532  ;;  %v531_v25 = vpop.permute.xlu0 %530  ;;  %v2186_v20 = vld [vmem:[%s2831_s3 + $0x4] sm:$0xf] }
  0x95   : > { %2156 = vmatpush1.msk.msra.mxu0 %vm373_vm4, %v356_v17  ;;  %523 = vmatprep.mubr.f32.mxu0 %v2380_v0  ;;  %v535_v26 = vsel %vm534_vm7, %v531_v25, %v533_v24  ;;  %v538_v28 = vsel %vm534_vm7, 0.0, %v531_v25 }
  0x96   : > { %v540_v29 = vmul.f32 %v535_v26, %v2557_v23  ;;  %v539_v32 = vmul.f32 %v538_v28, %v2565_v27 }
  0x98   : > { %2159 = vmatprep.subr.msk.mxu0 %vm373_vm4, %v540_v29  ;;  %v628_v30 = vpop.permute.xlu1 %627  ;;  %v626_v31 = vpop.permute.xlu0 %625 }
  0x99   : > { %v630_v34 = vsel %vm629_vm9, %v626_v31, %v628_v30  ;;  %v633_v36 = vsel %vm629_vm9, 0.0, %v626_v31 }
  0x9a   : > { %v635_v35 = vmul.f32 %v630_v34, %v2544_v14  ;;  %v634_v37 = vmul.f32 %v633_v36, %v2540_v12 }
  0x9c   : > { %2157 = vmatmul.mubr.msk.f32.vlgmr.msra.gmra.mrb[0].mxu0 %vm369_vm6, %v358_v33  ;;  %v805_v39 = vpop.permute.xlu0 %804  ;;  %v803_v43 = vpop.permute.xlu1 %802  ;;  %v1200_v33 = vld [vmem:[%s2831_s3] sm:$0xf] }
  0x9d   : > { %2160 = vmatpush1.msk.msra.mxu0 %vm373_vm4, %v539_v32  ;;  %616 = vmatprep.mubr.f32.mxu0 %v2380_v0  ;;  %v810_v40 = vsel %vm806_vm10, %v805_v39, 0.0  ;;  %v807_v45 = vsel %vm806_vm10, %v803_v43, %v805_v39 }
  0x9e   : > { %2163 = vmatprep.subr.msk.mxu0 %vm373_vm4, %v635_v35  ;;  %v812_v42 = vmul.f32 %v810_v40, %v2557_v23  ;;  %v811_v47 = vmul.f32 %v807_v45, %v2565_v27  ;;  %v2197_v45 = vld [vmem:[%s2831_s3 + $0xc] sm:$0xf] }
  0xa0   : > { %v900_v44 = vpop.permute.xlu0 %899  ;;  %v898_v50 = vpop.permute.xlu1 %897 }
  0xa1   : > { %v905_v46 = vsel %vm901_vm11, %v900_v44, 0.0  ;;  %v902_v51 = vsel %vm901_vm11, %v898_v50, %v900_v44 }
  0xa2   : > { %v907_v49 = vmul.f32 %v905_v46, %v2544_v14  ;;  %v906_v53 = vmul.f32 %v902_v51, %v2540_v12  ;;  %v2201_v51 = vld [vmem:[%s2831_s3 + $0x10] sm:$0xf] }
  0xa4   : > { %2161 = vmatmul.mubr.msk.f32.vlgmr.msra.gmra.mrb[0].mxu0 %vm369_vm6, %v2158_v38  ;;  %v995_v52 = vpop.permute.xlu0 %994  ;;  %v993_v57 = vpop.permute.xlu1 %992 }
  0xa5   : > { %2164 = vmatpush1.msk.msra.mxu0 %vm373_vm4, %v634_v37  ;;  %711 = vmatprep.mubr.f32.mxu0 %v2380_v0  ;;  %v999_v55 = vsel %vm996_vm12, %v995_v52, 0.0  ;;  %v997_v60 = vsel %vm996_vm12, %v993_v57, %v995_v52  ;;  %v2205_v57 = vld [vmem:[%s2831_s3 + $0x14] sm:$0xf] }
  0xa6   : > { %2167 = vmatprep.subr.msk.mxu0 %vm373_vm4, %v2505_v2 }
  0xa8   : > { %v1086_v56 = vpop.permute.xlu0 %1085  ;;  %v1084_v62 = vpop.permute.xlu1 %1083 }
  0xa9   : > { %v1091_v58 = vsel %vm1087_vm13, %v1086_v56, 0.0  ;;  %v1088_v63 = vsel %vm1087_vm13, %v1084_v62, %v1086_v56  ;;  %v2209_v62 = vld [vmem:[%s2831_s3 + $0x18] sm:$0xf] }
  0xaa   : > { %v1093_v61 = vmul.f32 %v1091_v58, %v2557_v23  ;;  %v1092_v2 = vmul.f32 %v1088_v63, %v2565_v27 }
  0xac   : > { %2165 = vmatmul.mubr.msk.f32.vlgmr.msra.gmra.mrb[0].mxu0 %vm369_vm6, %v2162_v41  ;;  %v2193_v41 = vld [vmem:[%s2831_s3 + $0x8] sm:$0xf] }
  0xad   : > { %2168 = vmatpush1.msk.msra.mxu0 %vm373_vm4, %v2497_v1  ;;  %793 = vmatprep.mubr.f32.mxu0 %v2380_v0 }
  0xae   : > { %2171 = vmatprep.subr.msk.mxu0 %vm373_vm4, %v812_v42 }
  0xb4   : > { %2169 = vmatmul.mubr.msk.f32.vlgmr.msra.gmra.mrb[0].mxu0 %vm369_vm6, %v2166_v48 }
  0xb5   : > { %2172 = vmatpush1.msk.msra.mxu0 %vm373_vm4, %v811_v47  ;;  %888 = vmatprep.mubr.f32.mxu0 %v2380_v0 }
  0xb6   : > { %2175 = vmatprep.subr.msk.mxu0 %vm373_vm4, %v907_v49 }
  0xb9   : > { %v1182_v6 = vpop.permute.xlu0 %1181 }
  0xbc   : > { %2173 = vmatmul.mubr.msk.f32.vlgmr.msra.gmra.mrb[0].mxu0 %vm369_vm6, %v2170_v54 }
  0xbd   : > { %2176 = vmatpush1.msk.msra.mxu0 %vm373_vm4, %v906_v53  ;;  %983 = vmatprep.mubr.f32.mxu0 %v2380_v0 }
  0xbe   : > { %2179 = vmatprep.subr.msk.mxu0 %vm373_vm4, %v999_v55 }
  0xc4   : > { %2177 = vmatmul.mubr.msk.f32.vlgmr.msra.gmra.mrb[0].mxu0 %vm369_vm6, %v2174_v59 }
  0xc5   : > { %2180 = vmatpush1.msk.msra.mxu0 %vm373_vm4, %v997_v60  ;;  %1074 = vmatprep.mubr.f32.mxu0 %v2380_v0 }
  0xc6   : > { %2183 = vmatprep.subr.msk.mxu0 %vm373_vm4, %v1093_v61 }
  0xcc   : > { %2181 = vmatmul.mubr.msk.f32.vlgmr.msra.gmra.mrb[0].mxu0 %vm369_vm6, %v2178_v3 }
  0xcd   : > { %2184 = vmatpush1.msk.msra.mxu0 %vm373_vm4, %v1092_v2  ;;  %1169 = vmatprep.mubr.f32.mxu0 %v2380_v0 }
  0xd4   : > { %2185 = vmatmul.mubr.msk.f32.vlgmr.msra.gmra.mrb[0].mxu0 %vm369_vm6, %v2182_v4  ;;  %v2213_v4 = vld [vmem:[%s2831_s3 + $0x1c] sm:$0xf] }
 0x1a7   : > { %v1171_v7 = vpop.f32.mrb[0].mxu0 }
 0x1a8   : > { %v1184_v8 = vadd.f32 %v1182_v6, %v1171_v7  ;;  %v1173_v9 = vpop.f32.mrb[1].mxu0 }
 0x1a9   : > { %v1185_v11 = vadd.f32 %v1182_v6, %v1173_v9 }
 0x1aa   : > { %v2643_v10 = vmax.f32 %v1184_v8, 0.0 }
 0x1ab   : > { %v1187_v13 = vmax.f32 %v1185_v11, 0.0 }
 0x1ac   : > { %1190 = vrot.lane.b32.xlu0 %v2643_v10, %s2381_s26  ;;  %1201 = vrot.lane.b32.xlu1 %v2643_v10, %s2382_s27 }
 0x1b0   : > { %1369 = vrot.lane.b32.xlu0 %v2643_v10, %s2383_s28  ;;  %1203 = vrot.lane.b32.xlu1 %v1187_v13, %s2382_s27 }
 0x1b4   : > { %1463 = vrot.lane.b32.xlu0 %v2643_v10, %s2384_s29  ;;  %1192 = vrot.lane.b32.xlu1 %v1187_v13, %s2381_s26 }
 0x1b8   : > { %1641 = vrot.lane.b32.xlu0 %v1187_v13, %s2385_s14  ;;  %1371 = vrot.lane.b32.xlu1 %v1187_v13, %s2383_s28 }
 0x1bc   : > { %1735 = vrot.lane.b32.xlu0 %v1187_v13, %s2386_s16  ;;  %1465 = vrot.lane.b32.xlu1 %v1187_v13, %s2384_s29 }
 0x1c0   : > { %1829 = vrot.lane.b32.xlu0 %v1187_v13, %s2387_s17  ;;  %1639 = vrot.lane.b32.xlu1 %v2643_v10, %s2385_s14  ;;  %s323_s14 = sand.u32 1, %s2370_s10  }
 0x1c1   : > { %s2071_s27 = scalar_lea.sflag [#allocation3], %s323_s14 }
 0x1c4   : > { %1919 = vrot.lane.b32.xlu0 %v1187_v13, %s2388_s21  ;;  %1733 = vrot.lane.b32.xlu1 %v2643_v10, %s2386_s16  ;;  %s2148_s16 = sshll.u32 %s323_s14, 3 }
 0x1c8   : > { %2014 = vperm.xlu0 %2310, %v2011_v15   ;;  %1827 = vrot.lane.b32.xlu1 %v2643_v10, %s2387_s17  ;;  %s2227_s17 = sshll.u32 %s2463_s13, 7  ;;  %s2391_s13 = smov [#allocation2]  }
 0x1c9   : > { %s2786_s25 = scalar_lea.hbm %s2837_s9, %s2227_s17  ;;  %s2320_s28 = sshll.u32 %s2391_s13, 4  ;;  %s2321_s28 = int_to_ptr.vmem [resolvable:$false] %s2320_s28 }
 0x1ca   : > { %s2322_s29 = scalar_lea.vmem %s2321_s28, 256 }
 0x1cc   : > { %1917 = vrot.lane.b32.xlu1 %v2643_v10, %s2388_s21  ;;  %s325_s21 = scalar_lea.vmem [#allocation2], %s2148_s16 }
 0x1cd   : > { %s2085_s22 = sshll.u32 %s325_s21, 4  ;;  %s2788_s22 = int_to_ptr.vmem [resolvable:$true] %s2085_s22 }
 0x1ce   : > { %s2316_s26 = scalar_lea.vmem %s2788_s22, 128  ;;  %p2323_p0 = scmp.lt.s32.totalorder %s2788_s22, %s2321_s28 }
 0x1cf   : > { %p2317_p11 = scmp.ne.s32.totalorder %s2788_s22, %s2316_s26  ;;  %p2324_p1 = scmp.lt.s32.totalorder %s2322_s29, %s2316_s26 }
 0x1d1   : > { %p2318_p12 = pnand %p2317_p11, %p2480_p5  ;;  %p2325_p2 = por %p2324_p1, %p2323_p0 }
 0x1d3   : > { %p2319_p13 = pneg %p2318_p12 }
 0x1d5   : > { %p2326_p3 = pnand %p2325_p2, %p2319_p13 }
 0x21e   : > { %v1202_v16 = vpop.permute.xlu1 %1201  ;;  %v1191_v17 = vpop.permute.xlu0 %1190 }
 0x21f   : > { %v1207_v21 = vsel %vm363_vm3, 0.0, %v1202_v16  ;;  %v1197_v22 = vsel %vm351_vm1, 0.0, %v1191_v17 }
 0x220   : > { %v1198_v29 = vmul.f32 %v1197_v22, %v2540_v12 }
 0x222   : > { %v1204_v18 = vpop.permute.xlu1 %1203  ;;  %v1370_v25 = vpop.permute.xlu0 %1369 }
 0x223   : > { %v1205_v19 = vsel %vm363_vm3, %v1202_v16, %v1204_v18  ;;  %v1376_v30 = vsel %vm534_vm7, 0.0, %v1370_v25 }
 0x224   : > { %2187 = vmatprep.subr.msk.mxu1 %vm373_vm4, %v1205_v19  ;;  %v1377_v35 = vmul.f32 %v1376_v30, %v2565_v27 }
 0x225   : > { %2188 = vmatpush1.msk.msra.mxu1 %vm373_vm4, %v1207_v21 }
 0x226   : > { %2189 = vmatmul.mubr.msk.f32.vlgmr.msra.gmra.mrb[0].mxu1 %vm369_vm6, %v2186_v20  ;;  %v1193_v24 = vpop.permute.xlu1 %1192  ;;  %v1464_v36 = vpop.permute.xlu0 %1463 }
 0x227   : > { %v1194_v26 = vsel %vm351_vm1, %v1191_v17, %v1193_v24  ;;  %1362 = vmatprep.mubr.f32.mxu1 %v2380_v0  ;;  %v1470_v40 = vsel %vm629_vm9, 0.0, %v1464_v36 }
 0x228   : > { %v1199_v28 = vmul.f32 %v1194_v26, %v2544_v14  ;;  %v1471_v42 = vmul.f32 %v1470_v40, %v2540_v12  ;;  %v2040_v26 = vshrl.u32 %v332_v5, 7  ;;  %v2047_v5 = vld [vmem:[%s2836_s8] sm:$0xf] }
 0x22a   : > { %2190 = vmatprep.subr.msk.mxu1 %vm373_vm4, %v1199_v28  ;;  %v1372_v31 = vpop.permute.xlu1 %1371  ;;  %v1642_v43 = vpop.permute.xlu0 %1641  ;;  %v2035_v28 = vld [vmem:[%s2834_s6] sm:$0x1] }
 0x22b   : > { %v1373_v32 = vsel %vm534_vm7, %v1370_v25, %v1372_v31  ;;  %2191 = vmatpush1.msk.msra.mxu1 %vm373_vm4, %v1198_v29  ;;  %v1646_v44 = vsel %vm806_vm10, %v1642_v43, 0.0  ;;  %v2041_v31 = vsub.s32 0, %v2040_v26 }
 0x22c   : > { %v1378_v34 = vmul.f32 %v1373_v32, %v2557_v23  ;;  %v1648_v46 = vmul.f32 %v1646_v44, %v2557_v23 }
 0x22e   : > { %2192 = vmatmul.mubr.msk.f32.vlgmr.msra.gmra.mrb[0].mxu1 %vm369_vm6, %v1200_v33  ;;  %2194 = vmatprep.subr.msk.mxu1 %vm373_vm4, %v1378_v34  ;;  %v1466_v37 = vpop.permute.xlu1 %1465  ;;  %v1736_v48 = vpop.permute.xlu0 %1735  ;;  %v2038_v33 = vld [vmem:[%s2835_s7] sm:$0xf] }
 0x22f   : > { %v1467_v38 = vsel %vm629_vm9, %v1464_v36, %v1466_v37  ;;  %2195 = vmatpush1.msk.msra.mxu1 %vm373_vm4, %v1377_v35  ;;  %1454 = vmatprep.mubr.f32.mxu1 %v2380_v0  ;;  %v1740_v50 = vsel %vm901_vm11, %v1736_v48, 0.0 }
 0x230   : > { %v1472_v39 = vmul.f32 %v1467_v38, %v2544_v14  ;;  %v1742_v53 = vmul.f32 %v1740_v50, %v2544_v14 }
 0x232   : > { %2198 = vmatprep.subr.msk.mxu1 %vm373_vm4, %v1472_v39  ;;  %v1640_v47 = vpop.permute.xlu1 %1639  ;;  %v1830_v55 = vpop.permute.xlu0 %1829 }
 0x233   : > { %v1643_v49 = vsel %vm806_vm10, %v1640_v47, %v1642_v43  ;;  %v1833_v14 = vsel %vm996_vm12, %v1830_v55, 0.0 }
 0x234   : > { %v1647_v52 = vmul.f32 %v1643_v49, %v2565_v27 }
 0x236   : > { %2196 = vmatmul.mubr.msk.f32.vlgmr.msra.gmra.mrb[0].mxu1 %vm369_vm6, %v2193_v41  ;;  %v1734_v54 = vpop.permute.xlu1 %1733  ;;  %v1920_v59 = vpop.permute.xlu0 %1919 }
 0x237   : > { %2199 = vmatpush1.msk.msra.mxu1 %vm373_vm4, %v1471_v42  ;;  %1548 = vmatprep.mubr.f32.mxu1 %v2380_v0  ;;  %v1737_v56 = vsel %vm901_vm11, %v1734_v54, %v1736_v48  ;;  %v1924_v61 = vsel %vm1087_vm13, %v1920_v59, 0.0 }
 0x238   : > { %2202 = vmatprep.subr.msk.mxu1 %vm373_vm4, %v1187_v13  ;;  %v1741_v58 = vmul.f32 %v1737_v56, %v2540_v12  ;;  %v1926_v12 = vmul.f32 %v1924_v61, %v2557_v23  ;;  %v2217_v23 = vld [vmem:[%s2831_s3 + $0x20] sm:$0xf] }
 0x23a   : > { %v1828_v60 = vpop.permute.xlu1 %1827 }
 0x23b   : > { %v1831_v63 = vsel %vm996_vm12, %v1828_v60, %v1830_v55 }
 0x23e   : > { %2200 = vmatmul.mubr.msk.f32.vlgmr.msra.gmra.mrb[0].mxu1 %vm369_vm6, %v2197_v45  ;;  %v1918_v2 = vpop.permute.xlu1 %1917  ;;  %v2390_v45 = vmov 839922192  }
 0x23f   : > { %2203 = vmatpush1.msk.msra.mxu1 %vm373_vm4, %v2643_v10  ;;  %1630 = vmatprep.mubr.f32.mxu1 %v2380_v0  ;;  %v1921_v3 = vsel %vm1087_vm13, %v1918_v2, %v1920_v59 }
 0x240   : > { %2206 = vmatprep.subr.msk.mxu1 %vm373_vm4, %v1648_v46  ;;  %v1925_v6 = vmul.f32 %v1921_v3, %v2565_v27  ;;  %v2061_v46 = vunpack.c.l.s4 %v2390_v45 }
 0x242   : > { %v2062_v47 = vunpack.c.0.s8 %v2061_v46 }
 0x244   : > { %v2065_v48 = vsub.s32 %v2062_v47, %v2040_v26 }
 0x246   : > { %2204 = vmatmul.mubr.msk.f32.vlgmr.msra.gmra.mrb[0].mxu1 %vm369_vm6, %v2201_v51 }
 0x247   : > { %2207 = vmatpush1.msk.msra.mxu1 %vm373_vm4, %v1647_v52  ;;  %1724 = vmatprep.mubr.f32.mxu1 %v2380_v0  ;;  %v2015_v7 = vpop.permute.xlu0 %2014 }
 0x248   : > { %2210 = vmatprep.subr.msk.mxu1 %vm373_vm4, %v1742_v53 }
 0x24e   : > { %2208 = vmatmul.mubr.msk.f32.vlgmr.msra.gmra.mrb[0].mxu1 %vm369_vm6, %v2205_v57 }
 0x24f   : > { %2211 = vmatpush1.msk.msra.mxu1 %vm373_vm4, %v1741_v58  ;;  %1818 = vmatprep.mubr.f32.mxu1 %v2380_v0 }
 0x250   : > { %2214 = vmatprep.subr.msk.mxu1 %vm373_vm4, %v1833_v14 }
 0x256   : > { %2212 = vmatmul.mubr.msk.f32.vlgmr.msra.gmra.mrb[0].mxu1 %vm369_vm6, %v2209_v62 }
 0x257   : > { %2215 = vmatpush1.msk.msra.mxu1 %vm373_vm4, %v1831_v63  ;;  %1908 = vmatprep.mubr.f32.mxu1 %v2380_v0 }
 0x258   : > { %2218 = vmatprep.subr.msk.mxu1 %vm373_vm4, %v1926_v12 }
 0x25e   : > { %2216 = vmatmul.mubr.msk.f32.vlgmr.msra.gmra.mrb[0].mxu1 %vm369_vm6, %v2213_v4 }
 0x25f   : > { %2219 = vmatpush1.msk.msra.mxu1 %vm373_vm4, %v1925_v6  ;;  %2002 = vmatprep.mubr.f32.mxu1 %v2380_v0  ;;  %v2025_v0 = vld [vmem:[%s2833_s5] sm:$0xf] }
 0x266   : > { %2220 = vmatmul.mubr.msk.f32.vlgmr.msra.gmra.mrb[0].mxu1 %vm369_vm6, %v2217_v23 }
 0x339   : > { %v2004_v8 = vpop.f32.mrb[0].mxu1 }
 0x33a   : > { %v2017_v9 = vadd.f32 %v2015_v7, %v2004_v8  ;;  %v2006_v10 = vpop.f32.mrb[1].mxu1 }
 0x33b   : > { %v2018_v11 = vadd.f32 %v2015_v7, %v2006_v10 }
 0x33c   : > { %v2019_v13 = vsel %vm373_vm4, %v2017_v9, 0.0 }
 0x33d   : > { %v2020_v27 = vsel %vm373_vm4, %v2018_v11, 0.0 }
 0x33e   : > { %v2021_v15 = vadd.f32 %v2020_v27, %v2019_v13 }
 0x340   : > { %2022 = vadd.xlane.f32.xlu1 %v2021_v15 }
 0x3cd   : > { %v2023_v16 = vpop.xlane.xlu1 %2022 }
 0x3ce   : > { %v2024_v17 = vmul.f32 0.00390625, %v2023_v16 }
 0x3d0   : > { %v2026_v18 = vmul.f32 %v2025_v0, %v2024_v17 }
 0x3d2   : > { %v2028_v19 = vsel %vm2027_vm14, %v2026_v18, 0.0 }
 0x3d3   : > { %v2029_v20 = vrot.slane %v2028_v19, 4 }
 0x3d5   : > { %v2030_v21 = vadd.f32 %v2029_v20, %v2028_v19 }
 0x3d7   : > { %v2031_v22 = vrot.slane %v2030_v21, 2 }
 0x3d9   : > { %v2032_v24 = vadd.f32 %v2031_v22, %v2030_v21 }
 0x3db   : > { %v2033_v25 = vrot.slane %v2032_v24, 1 }
 0x3dd   : > { %v2034_v29 = vadd.f32 %v2033_v25, %v2032_v24 }
 0x3df   : > { %v2036_v30 = vadd.f32 %v2035_v28, %v2034_v29 }
 0x3e1   : > { %v2037_v32 = vmax.f32 %v2036_v30, 0.0 }
 0x3e3   : > { %v2042_v34 = vrot.slane %v2037_v32, %v2041_v31 }
 0x3e5   : > { %v2043_v35 = vmul.f32 %v2042_v34, %v2038_v33 }
 0x3e7   : > { %v2044_v36 = vsel %vm2027_vm14, %v2043_v35, 0.0 }
 0x3e8   : > { %2045 = vadd.xlane.f32.xlu0 %v2044_v36 }
 0x475   : > { %v2046_v37 = vpop.xlane.xlu0 %2045 }
 0x476   : > { %v2048_v38 = vadd.f32 %v2047_v5, %v2046_v37 }
 0x478   : > { %v2049_v39 = vsub.f32 0.0, %v2048_v38 }
 0x47a   : > { %v2050_v40 = vmul.f32 1.442695, %v2049_v39 }
 0x47c   : > { %2312 = vpow2.f32 %v2050_v40 }
 0x486   : > { %v2313_v41 = vpop.eup %2312 }
 0x487   : > { %v2052_v42 = vadd.f32 1.0, %v2313_v41 }
 0x489   : > { %2314 = vrcp.f32 %v2052_v42 }
 0x493   : > { %v2315_v43 = vpop.eup %2314 }
 0x494   : > { %v2055_v44 = vmul.f32 %v2315_v43, %v2024_v17 }
 0x496   : > { %2058 = vperm.xlu0 %2310, %v2055_v44  }
 0x515   : > { %v2059_v49 = vpop.permute.xlu0 %2058 }
 0x516   : > { %v2066_v50 = vrot.slane %v2059_v49, %v2065_v48 }
 0x518   : > { %v2068_v51 = vadd.f32 %v2066_v50, %v2497_v1 }
 0x51a   : > { %2069 = vst [vmem:[%s325_s21] sm:$0xff] %v2068_v51 }
 0x51b   : > { %2329 = shalt.err (!%p2326_p3)
}
 0x51c   : > { %s2330_s14 = scalar_lea.hbm %s2786_s25, 128  ;;  %s2334_s21 = scalar_lea.hbm %s2837_s9, 256 }
 0x51d   : > { %p2331_p4 = scmp.ne.s32.totalorder %s2786_s25, %s2330_s14  ;;  %p2335_p9 = scmp.lt.u32.totalorder %s2786_s25, %s2837_s9 }
 0x51e   : > { %p2336_p10 = scmp.lt.u32.totalorder %s2334_s21, %s2330_s14  ;;  %p2338_p12 = scmp.lt.u32.totalorder %s2330_s14, %s2786_s25 }
 0x51f   : > { %p2332_p7 = pnand %p2331_p4, %p2480_p5 }
 0x520   : > { %p2337_p11 = por %p2336_p10, %p2335_p9 }
 0x521   : > { %p2333_p8 = pneg %p2332_p7 }
 0x522   : > { %p2339_p13 = por %p2338_p12, %p2337_p11 }
 0x524   : > { %p2340_p0 = pnand %p2339_p13, %p2333_p8 }
 0x526   : > { %2343 = shalt.err (!%p2340_p0)
}
 0x527   : > { %2260 = dma.vmem_to_hbm [thread:$0]  (%p2480_p5), %s2788_s22, 128, %s2786_s25, %s2071_s27  }
 0x528 PF: > { %p2266_p1 = scmp.ge.s32.totalorder %s2378_s12, 2  ;;  %s2097_s26 = sand.u32 1, %s2366_s30  }
 0x529   : > { %s2098_s13 = scalar_lea.sflag [#allocation3], %s2097_s26 }
 0x52a   : > { %p2263_p2 = pnand %p2266_p1, %p2484_p6 }
 0x52c   : > { %2361 = dma.done.wait (!%p2263_p2), %s2098_s13, 128  }
 0x52d   : > { %2363 = vsyncadd (!%p2263_p2), %s2098_s13, 4294967168  ;;  %p19_p3 = scmp.ge.s32.totalorder %s2467_s15, 4   ;;  %s2840_s30 = smov %s2370_s10 }
 0x52e   : > { %s2841_s10 = smov %s2374_s11  ;;  %s2842_s11 = smov %s2478_s18 }
 0x52f   : > { %s2843_s12 = smov %s2467_s15  ;;  %21 = sbr.rel (!%p19_p3) target bundleno = 3 (0x3), region = 107 }
 0x536   :  { %2103 = vsyncpa [#allocation3], 1 }
 0x537   :  { %2105 = vsyncpa [#allocation3 + $0x1], 1 }

</bundles_post_ra>
